<compile_context>
chip_gen: v7x
topology: tpu7x:2x2x1
jax: 0.10.0
libtpu: 0.0.40
codegen_flags: <defaults>
</compile_context>

<pallas_src>
import math

import numpy as np
import jax
import jax.numpy as jnp
from jax.experimental import pallas as pl
from jax.experimental.pallas import tpu as pltpu


def fourier_projector_kernel(x_ref, basis_ref, out_ref):
    # x_ref:     [tb, C*L]  native dtype (bf16/f32), streamed from HBM
    # basis_ref: [nb, C*L]  masked, 1/C-scaled basis (replicated over C)
    # out_ref:   [tb, nb]   f32 projection
    out_ref[...] = jax.lax.dot_general(
        x_ref[...], basis_ref[...],
        dimension_numbers=(((1,), (1,)), ((), ())),
        preferred_element_type=jnp.float32)


def _physical_vmem_bytes():
    try:
        info = pltpu.get_tpu_info()
        for attr in ("vmem_capacity_bytes", "vmem_bytes"):
            v = getattr(info, attr, None)
            if v:
                return int(v)
    except Exception:
        pass
    return 64 * 1024 * 1024          # conservative fallback (v7x per-TC VMEM)


def _pick_b_tile(B, row_bytes):
    """Largest multiple-of-8 B tile whose double-buffered x stream fits VMEM."""
    phys = _physical_vmem_bytes()
    x_budget = int(phys * 0.55)                     # 2 buffers of the x tile
    tb = x_budget // (2 * max(row_bytes, 1))
    tb = max(8, (tb // 8) * 8)
    if tb >= B:
        if B >= 16:
            # keep >= 2 grid steps so v7x's two TensorCores both get work
            tb = max(8, ((B // 2) + 7) // 8 * 8)
        else:
            tb = B                                  # single full-batch block
    vmem_limit = max(32 * 1024 * 1024, int(phys * 0.8))
    return tb, vmem_limit


def fourier_projector(x, x_mark, input_mask, n_freq=3):
    B, C, L = x.shape
    nb = 2 * n_freq

    # --- hoisted, tile-invariant preprocessing (plain JAX, tiny arrays) ----
    t = x_mark[0, :, 0].astype(jnp.float32)               # [L] batch-0 timestamps
    m = (input_mask[0, :] == 1).astype(jnp.float32)       # [L] 0/1 mask

    # T_total = max timestamp over valid positions; hoist the reciprocal.
    T_total = jnp.max(jnp.where(m > 0.0, t, -jnp.inf))
    inv_T = 1.0 / T_total

    # Interleaved basis rows: row 2k -> sin(2*pi*k*t/T), row 2k+1 -> cos(...)
    # using cos(x) = sin(x + pi/2): one transcendental per basis element.
    k = jnp.repeat(jnp.arange(n_freq, dtype=jnp.float32), 2)                 # [nb]
    phase = jnp.tile(jnp.array([0.0, 0.5 * math.pi], jnp.float32), n_freq)   # [nb]
    omega = (2.0 * math.pi) * k * inv_T                                      # [nb]
    basis = jnp.sin(omega[:, None] * t[None, :] + phase[:, None])            # [nb, L]
    # Fold the 0/1 mask and the 1/C of the channel mean into the basis so the
    # kernel is a single contraction (masked positions contribute exactly 0).
    basis = basis * (m[None, :] * (1.0 / C))                                 # [nb, L]

    # Replicate over channels: [B, C*L] x [nb, C*L]^T == mean_c + projection.
    basis_flat = jnp.tile(basis, (1, C)).astype(x.dtype)                     # [nb, C*L]
    x_flat = x.reshape(B, C * L)                                             # native dtype

    # --- tiling: size the B tile against this generation's VMEM ------------
    row_bytes = C * L * np.dtype(x_flat.dtype).itemsize
    tb, vmem_limit = _pick_b_tile(B, row_bytes)
    grid = (pl.cdiv(B, tb),)

    return pl.pallas_call(
        fourier_projector_kernel,
        out_shape=jax.ShapeDtypeStruct((B, nb), jnp.float32),
        grid=grid,
        in_specs=[
            pl.BlockSpec((tb, C * L), lambda i: (i, 0)),   # x stream (native dtype)
            pl.BlockSpec((nb, C * L), lambda i: (0, 0)),   # tiny resident basis
        ],
        out_specs=pl.BlockSpec((tb, nb), lambda i: (i, 0)),
        compiler_params=pltpu.CompilerParams(
            dimension_semantics=("parallel",),             # v7x: shard over 2 TCs
            vmem_limit_bytes=int(vmem_limit)),
    )(x_flat, basis_flat)


if __name__ == "__main__":
    key = jax.random.PRNGKey(0)
    B, C, L, F = 2, 4, 16, 3
    n_freq = 3

    kx, km = jax.random.split(key)
    x = jax.random.normal(kx, (B, C, L), jnp.float32)
    x_mark = jax.random.normal(km, (B, L, F), jnp.float32)
    # feature 0 of x_mark carries (positive) timestamps
    times = jnp.arange(1, L + 1, dtype=jnp.float32)
    x_mark = x_mark.at[:, :, 0].set(times[None, :])
    # mask out the last 3 positions to exercise the gather/mask path
    input_mask = jnp.ones((B, L), jnp.int32).at[:, L - 3:].set(0)

    proj = jax.block_until_ready(fourier_projector(x, x_mark, input_mask, n_freq))

    # numpy reference mirroring the PyTorch gather-based forward exactly
    xn = np.asarray(x)
    xmn = np.asarray(x_mark)
    mn = np.asarray(input_mask)
    pos = np.nonzero(mn[0] == 1)[0]
    tt = xmn[0][:, 0].astype(np.float32)[pos]
    T_total = tt.max()
    x1 = xn[:, :, pos].astype(np.float32).mean(axis=1)
    basis = []
    for kk in range(n_freq):
        basis.append(np.sin(2 * np.pi * kk * tt / T_total))
        basis.append(np.cos(2 * np.pi * kk * tt / T_total))
    basis = np.stack(basis, axis=1)
    ref = x1 @ basis

    np.testing.assert_allclose(np.asarray(proj), ref, rtol=1e-4, atol=1e-4)
    print("KERNEL_OK")
</pallas_src>

<mosaic_0001>
module attributes {stable_mosaic.version = 11 : i64} {
  func.func @fourier_projector_kernel(%arg0: i32, %arg1: memref<2x64xf32, #tpu.memory_space<vmem>>, %arg2: memref<6x64xf32, #tpu.memory_space<vmem>>, %arg3: memref<2x6xf32, #tpu.memory_space<vmem>>) attributes {dimension_semantics = [#tpu.dimension_semantics<parallel>], iteration_bounds = array<i64: 1>, scalar_prefetch = 0 : i64, scratch_operands = 0 : i64, tpu.core_type = #tpu.core_type<tc>, window_params = [{transform_indices = @transform_0, window_bounds = array<i64: 2, 64>}, {pipeline_mode = #tpu.pipeline_mode<synchronous>, transform_indices = @transform_1, window_bounds = array<i64: 6, 64>}, {transform_indices = @transform_2, window_bounds = array<i64: 2, 6>}]} {
    %c0 = arith.constant 0 : index
    %c0_0 = arith.constant 0 : index
    %0 = vector.load %arg1[%c0, %c0_0] : memref<2x64xf32, #tpu.memory_space<vmem>>, vector<2x64xf32>
    %c0_1 = arith.constant 0 : index
    %c0_2 = arith.constant 0 : index
    %1 = vector.load %arg2[%c0_1, %c0_2] : memref<6x64xf32, #tpu.memory_space<vmem>>, vector<6x64xf32>
    %cst = arith.constant dense<0.000000e+00> : vector<2x6xf32>
    %2 = tpu.matmul %0, %1, %cst {dimension_numbers = #tpu.dot_dimension_numbers<[1], [1], [0], [0], [0, 0, 1, 0], [], []>} : vector<2x64xf32>, vector<6x64xf32>, vector<2x6xf32> -> vector<2x6xf32>
    %c0_3 = arith.constant 0 : index
    %c0_4 = arith.constant 0 : index
    %3 = vector.load %arg3[%c0_3, %c0_4] : memref<2x6xf32, #tpu.memory_space<vmem>>, vector<2x6xf32>
    tpu.vector_store %arg3[%c0_3, %c0_4], %2 {strides = array<i32>} : memref<2x6xf32, #tpu.memory_space<vmem>>, vector<2x6xf32>,
    return
  }
  func.func @transform_0(%arg0: i32) -> (i32, i32) {
    %c0_i32 = arith.constant 0 : i32
    %c0_i32_0 = arith.constant 0 : i32
    return %arg0, %c0_i32 : i32, i32
  }
  func.func @transform_1(%arg0: i32) -> (i32, i32) {
    %c0_i32 = arith.constant 0 : i32
    %c0_i32_0 = arith.constant 0 : i32
    %c0_i32_1 = arith.constant 0 : i32
    return %c0_i32, %c0_i32_0 : i32, i32
  }
  func.func @transform_2(%arg0: i32) -> (i32, i32) {
    %c0_i32 = arith.constant 0 : i32
    %c0_i32_0 = arith.constant 0 : i32
    return %arg0, %c0_i32 : i32, i32
  }
}

</mosaic_0001>

<bundles_post_ra>
// kernel: tpu_custom_call.1
= control target key start
LH: loop header
LB: loop body
LE: loop exit
PB: predicated region body
PF: predicated region fallthrough
CT: control target
= control target key end

     0   :  { %7 = vsyncpa [#allocation3], 0  ;;  %s275_s0 = inlined_call_operand.hbm [shape: f32[2,64], index: 0, kind: input, shape index: {}]   ;;  %s276_s1 = inlined_call_operand.hbm [shape: f32[6,64], index: 1, kind: input, shape index: {}]   ;;  %s277_s2 = inlined_call_operand.hbm [shape: f32[2,6], index: 2, kind: output, shape index: {}]  }
   0x1   :  { %8 = vsyncpa [#allocation6], 0 }
   0x2   :  { %9 = vsyncpa [#allocation4], 0  ;;  %s219_s9 = smov [#allocation2]   ;;  %s220_s11 = smov [#allocation5]  }
   0x3   :  { %s16_s10 = sshll.u32 %s219_s9, 4  ;;  %s26_s12 = sshll.u32 %s220_s11, 4  ;;  %s17_s10 = int_to_ptr.vmem [resolvable:$true] %s16_s10  ;;  %s27_s12 = int_to_ptr.vmem [resolvable:$true] %s26_s12 }
   0x4   :  { %s147_s15 = scalar_lea.hbm %s275_s0, 32 }
   0x5   :  { %p148_p0 = scmp.ne.s32.totalorder %s275_s0, %s147_s15  ;;  %p151_p1 = scmp.lt.u32.totalorder %s147_s15, %s275_s0 }
   0x7   :  { %p153_p2 = pnand %p151_p1, %p148_p0 }
   0x9   :  { %156 = shalt.err (!%p153_p2)
}
   0xa   :  { %s157_s20 = scalar_lea.vmem %s17_s10, 32  ;;  %p162_p4 = scmp.lt.s32.totalorder %s17_s10, %s17_s10 }
   0xb   :  { %p158_p3 = scmp.ne.s32.totalorder %s17_s10, %s157_s20  ;;  %p163_p5 = scmp.lt.s32.totalorder %s157_s20, %s157_s20 }
   0xd   :  { %p164_p6 = por %p163_p5, %p162_p4 }
   0xf   :  { %p165_p7 = pnand %p164_p6, %p158_p3 }
  0x11   :  { %168 = shalt.err (!%p165_p7)
}
  0x12   :  { %19 = dma.hbm_to_vmem [thread:$0]  %s275_s0, 32, %s17_s10, [#allocation3]  }
  0x13   :  { %s169_s25 = scalar_lea.hbm %s276_s1, 128 }
  0x14   :  { %p170_p8 = scmp.ne.s32.totalorder %s276_s1, %s169_s25  ;;  %p173_p9 = scmp.lt.u32.totalorder %s169_s25, %s276_s1 }
  0x16   :  { %p175_p10 = pnand %p173_p9, %p170_p8 }
  0x18   :  { %178 = shalt.err (!%p175_p10)
}
  0x19   :  { %s179_s30 = scalar_lea.vmem %s27_s12, 128  ;;  %p184_p12 = scmp.lt.s32.totalorder %s27_s12, %s27_s12 }
  0x1a   :  { %p180_p11 = scmp.ne.s32.totalorder %s27_s12, %s179_s30  ;;  %p185_p13 = scmp.lt.s32.totalorder %s179_s30, %s179_s30 }
  0x1c   :  { %p186_p0 = por %p185_p13, %p184_p12 }
  0x1e   :  { %p187_p1 = pnand %p186_p0, %p180_p11 }
  0x20   :  { %190 = shalt.err (!%p187_p1)
}
  0x21   :  { %29 = dma.hbm_to_vmem [thread:$0]  %s276_s1, 128, %s27_s12, [#allocation6]  }
  0x22   :  { %213 = dma.done.wait [#allocation3], 32  }
  0x23   :  { %214 = vsyncadd [#allocation3], 4294967264 }
  0x24   :  { %215 = dma.done.wait [#allocation6], 128  }
  0x25   :  { %216 = vsyncadd [#allocation6], 4294967168  ;;  %v221_v0 = vmov 0.0   ;;  %vm222_vm0 = vmmov 0   ;;  %vm38_vm1 = vcmask 523264   ;;  %s223_s4 = smov [#allocation7]  }
  0x26   :  { %137 = vmatprep.subr.mxu0 %v221_v0  ;;  %139 = vmatprep.mubr.msk.f32.mxu0 %vm222_vm0, %v221_v0  ;;  %v37_v1 = vld [vmem:[#allocation5] sm:$0x3f]  ;;  %v36_v2 = vld [vmem:[#allocation2] sm:$0x3]  ;;  %s123_s5 = sshll.u32 %s223_s4, 4  ;;  %vm115_vm2 = vcmask 41984   ;;  %s124_s5 = int_to_ptr.vmem [resolvable:$true] %s123_s5 }
  0x27   :  { %138 = vmatpush3.xpose.msk.msra.mxu0 %vm38_vm1, %v37_v1  ;;  %s191_s1 = scalar_lea.vmem %s124_s5, 32  ;;  %p196_p3 = scmp.lt.s32.totalorder %s124_s5, %s124_s5 }
  0x28   :  { %p192_p2 = scmp.ne.s32.totalorder %s124_s5, %s191_s1  ;;  %p197_p4 = scmp.lt.s32.totalorder %s191_s1, %s191_s1 }
  0x2a   :  { %140 = vmatmul.mubr.msk.f32.vlgmr.msra.gmra.mrb[0].mxu0 %vm38_vm1, %v36_v2  ;;  %p198_p5 = por %p197_p4, %p196_p3 }
  0x2c   :  { %p199_p6 = pnand %p198_p5, %p192_p2 }
  0xfd   :  { %v111_v3 = vpop.f32.mrb[0].mxu0 }
  0xfe   :  { %v141_v4 = vpop.f32.mrb[1].mxu0  ;;  %116 = vst.msk [vmem:[#allocation7] sm:$0x3] %vm115_vm2, %v111_v3 }
  0xff   :  { %202 = shalt.err (!%p199_p6)
}
 0x100   :  { %s203_s8 = scalar_lea.hbm %s277_s2, 32 }
 0x101   :  { %p204_p7 = scmp.ne.s32.totalorder %s277_s2, %s203_s8  ;;  %p207_p8 = scmp.lt.u32.totalorder %s203_s8, %s277_s2 }
 0x103   :  { %p209_p9 = pnand %p207_p8, %p204_p7 }
 0x105   :  { %212 = shalt.err (!%p209_p9)
}
 0x106   :  { %126 = dma.vmem_to_hbm [thread:$0]  %s124_s5, 32, %s277_s2, [#allocation4]  }
 0x107   :  { %217 = dma.done.wait [#allocation4], 32  }
 0x108   :  { %218 = vsyncadd [#allocation4], 4294967264 }
 0x109   :  { %130 = vsyncpa [#allocation3], 1 }
 0x10a   :  { %131 = vsyncpa [#allocation6], 1 }
 0x10b   :  { %132 = vsyncpa [#allocation4], 1 }

</bundles_post_ra>
